<compile_context>
chip_gen: v7x
topology: tpu7x:2x2x1
jax: 0.10.0
libtpu: 0.0.40
codegen_flags: <defaults>
</compile_context>

<pallas_src>
import functools

import jax
import jax.numpy as jnp
from jax import lax
from jax.experimental import pallas as pl
from jax.experimental.pallas import tpu as pltpu

# ---- constants mirroring CLIPLoss.__init__ ----
CLIP_MEAN = (0.48145466, 0.4578275, 0.40821073)
CLIP_STD = (0.26862954, 0.26130258, 0.27577711)


def _round_up(x, m):
    return ((x + m - 1) // m) * m


# ---------------------------------------------------------------------------
# Fused kernel:   [sketch ; targets]  (Npad, F) bf16   @   W' (F, Dpad) bf16
#   K-tiled reduction, f32 VMEM accumulator, loss epilogue on the last K step.
#   Output o: (Npad, 128) f32, row r (r>=1) holds (broadcast across lanes)
#       num_augs * (1 - cos(sketch_feature, target_feature[r-1]))
# ---------------------------------------------------------------------------
def _clip_loss_fused_kernel(x_ref, w_ref, bias_ref, o_ref, acc_ref, *, num_augs):
    k = pl.program_id(0)

    @pl.when(k == 0)
    def _init():
        acc_ref[...] = jnp.zeros_like(acc_ref)

    # MXU: bf16 x bf16 -> f32 accumulate (the only heavy work per grid step).
    acc_ref[...] += jnp.dot(
        x_ref[...], w_ref[...], preferred_element_type=jnp.float32
    )

    @pl.when(k == pl.num_programs(0) - 1)
    def _finalize():
        feats = acc_ref[...] + bias_ref[...]                    # (Npad, Dpad) f32
        eps = jnp.float32(1e-8)
        sq = jnp.sum(feats * feats, axis=1, keepdims=True)      # (Npad, 1)
        # min(rsqrt(||x||^2), 1/eps) == 1 / max(||x||, eps)  (torch eps clamping)
        inv_norm = jnp.minimum(lax.rsqrt(sq), 1.0 / eps)        # (Npad, 1)
        s_feat = feats[0:1, :]                                  # sketch feature row
        dots = jnp.sum(feats * s_feat, axis=1, keepdims=True)   # (Npad, 1)
        cos = dots * inv_norm * inv_norm[0:1, :]                # (Npad, 1)
        loss = jnp.float32(num_augs) * (1.0 - cos)              # (Npad, 1)
        o_ref[...] = jnp.broadcast_to(loss, o_ref.shape)        # lane-dense slab


# ---------------------------------------------------------------------------
# CLIPLoss.forward (mode='train') equivalent
# ---------------------------------------------------------------------------
def clip_loss_forward(sketches, targets, w_enc, num_augs, *,
                      tk_max=4096, w_tile_budget_bytes=3 * 1024 * 1024):
    """loss[b] = sum_{n<num_augs} (1 - cos(encode(norm(sketch)), encode(norm(target_b))))."""
    _, C, H, W = sketches.shape
    B_t = targets.shape[0]
    F = C * H * W
    D = w_enc.shape[1]

    # Per-channel CLIP Normalize constants, broadcast over flattened (C,H,W).
    mean = jnp.repeat(jnp.asarray(CLIP_MEAN, jnp.float32), H * W)          # (F,)
    inv_std = jnp.repeat(1.0 / jnp.asarray(CLIP_STD, jnp.float32), H * W)  # (F,)

    # Fold Normalize into the encoder: x @ W' + bias.
    w_f32 = w_enc.astype(jnp.float32)
    w_fold = inv_std[:, None] * w_f32                                      # (F, D)
    bias = -(mean * inv_std) @ w_f32                                       # (D,)

    # Stack [sketch ; targets] so the weights are streamed from HBM once.
    x = jnp.concatenate(
        [sketches[0:1].reshape(1, F), targets.reshape(B_t, F)], axis=0
    )                                                                      # (1+Bt, F)
    n_rows = 1 + B_t

    # TPU layout padding: rows -> multiple of 8 sublanes, D -> multiple of 128
    # lanes, K -> multiple of the K tile (itself a multiple of 128).
    n_pad = max(8, _round_up(n_rows, 8))
    d_pad = _round_up(D, 128)
    f_128 = _round_up(F, 128)

    # K tile: multiple of 128 so that one (tk, d_pad) bf16 weight tile stays
    # under the budget -> double-buffered it fits every generation's scoped
    # VMEM default (v5e 16 MiB / v6e 32 MiB / v7x 32 MiB) with headroom.
    tk_budget = max(128, (w_tile_budget_bytes // (d_pad * 2)) // 128 * 128)
    tk = min(tk_max, tk_budget, f_128)
    f_tot = _round_up(f_128, tk)
    k_steps = f_tot // tk

    # Pad directly in bf16 (no padded f32 temporaries on the wrapper side).
    x_p = (
        jnp.zeros((n_pad, f_tot), jnp.bfloat16)
        .at[:n_rows, :F].set(x.astype(jnp.bfloat16))
    )
    w_p = (
        jnp.zeros((f_tot, d_pad), jnp.bfloat16)
        .at[:F, :D].set(w_fold.astype(jnp.bfloat16))
    )
    bias_p = jnp.zeros((1, d_pad), jnp.float32).at[0, :D].set(bias)

    out = pl.pallas_call(
        functools.partial(_clip_loss_fused_kernel, num_augs=float(num_augs)),
        out_shape=jax.ShapeDtypeStruct((n_pad, 128), jnp.float32),
        grid=(k_steps,),
        in_specs=[
            pl.BlockSpec((n_pad, tk), lambda k: (0, k)),    # activations (K-tiled)
            pl.BlockSpec((tk, d_pad), lambda k: (k, 0)),    # weights     (K-tiled)
            pl.BlockSpec((1, d_pad), lambda k: (0, 0)),     # bias (resident)
        ],
        out_specs=pl.BlockSpec((n_pad, 128), lambda k: (0, 0)),
        scratch_shapes=[pltpu.VMEM((n_pad, d_pad), jnp.float32)],
        compiler_params=pltpu.CompilerParams(
            dimension_semantics=("arbitrary",)
        ),
    )(x_p, w_p, bias_p)

    # Row 0 is the sketch vs itself; rows 1..Bt are the per-target losses.
    return out[1:1 + B_t, 0]


# ---------------------------------------------------------------------------
# Pure-JAX reference (f32) for a sanity check.
# ---------------------------------------------------------------------------
def _reference_loss(sketches, targets, w_enc, num_augs):
    _, C, H, W = sketches.shape
    F = C * H * W
    mean = jnp.repeat(jnp.asarray(CLIP_MEAN, jnp.float32), H * W)
    inv_std = jnp.repeat(1.0 / jnp.asarray(CLIP_STD, jnp.float32), H * W)

    def encode(imgs):
        x = imgs.reshape(imgs.shape[0], F).astype(jnp.float32)
        xn = (x - mean) * inv_std
        return xn @ w_enc.astype(jnp.float32)

    s = encode(sketches[0:1])          # (1, D)
    t = encode(targets)                # (Bt, D)
    eps = 1e-8
    sn = jnp.maximum(jnp.linalg.norm(s, axis=1, keepdims=True), eps)
    tn = jnp.maximum(jnp.linalg.norm(t, axis=1, keepdims=True), eps)
    cos = (t @ s.T)[:, 0] / (tn[:, 0] * sn[0, 0])
    return num_augs * (1.0 - cos)


if __name__ == "__main__":
    key = jax.random.PRNGKey(0)
    k_sk, k_tg, k_w = jax.random.split(key, 3)

    # Small shapes consistent with the forward (NCHW RGB images, 1 sketch,
    # a small batch of targets, stand-in embedding dim).
    B_s, B_t, C, H, W = 1, 2, 3, 16, 16
    FEAT_DIM = 32        # stand-in for CLIP's 512-dim embedding
    NUM_AUGS = 4         # args.num_aug_clip

    sketches = jax.random.uniform(k_sk, (B_s, C, H, W), jnp.float32)
    targets = jax.random.uniform(k_tg, (B_t, C, H, W), jnp.float32)
    # deterministic synthetic encoder weights (stand-in for CLIP encode_image)
    w_enc = jax.random.normal(k_w, (C * H * W, FEAT_DIM), jnp.float32) * 0.02

    loss = clip_loss_forward(sketches, targets, w_enc, NUM_AUGS)
    jax.block_until_ready(loss)
    assert loss.shape == (B_t,)

    ref = _reference_loss(sketches, targets, w_enc, NUM_AUGS)
    assert jnp.all(jnp.abs(loss - ref) < 0.2), (loss, ref)   # bf16 matmul tolerance

    print("KERNEL_OK")
</pallas_src>

<mosaic_0001>
module attributes {stable_mosaic.version = 11 : i64} {
  func.func @_clip_loss_fused_kernel(%arg0: i32, %arg1: memref<8x768xbf16, #tpu.memory_space<vmem>>, %arg2: memref<768x128xbf16, #tpu.memory_space<vmem>>, %arg3: memref<1x128xf32, #tpu.memory_space<vmem>>, %arg4: memref<8x128xf32, #tpu.memory_space<vmem>>, %arg5: memref<8x128xf32, #tpu.memory_space<vmem>>) attributes {dimension_semantics = [#tpu.dimension_semantics<arbitrary>], iteration_bounds = array<i64: 1>, scalar_prefetch = 0 : i64, scratch_operands = 1 : i64, tpu.core_type = #tpu.core_type<tc>, window_params = [{transform_indices = @transform_0, window_bounds = array<i64: 8, 768>}, {transform_indices = @transform_1, window_bounds = array<i64: 768, 128>}, {pipeline_mode = #tpu.pipeline_mode<synchronous>, transform_indices = @transform_2, window_bounds = array<i64: 1, 128>}, {pipeline_mode = #tpu.pipeline_mode<synchronous>, transform_indices = @transform_3, window_bounds = array<i64: 8, 128>}]} {
    %c0_i32 = arith.constant 0 : i32
    %0 = arith.cmpi eq, %arg0, %c0_i32 : i32
    %1 = arith.extui %0 : i1 to i32
    %c0_i32_0 = arith.constant 0 : i32
    %2 = arith.cmpi ne, %1, %c0_i32_0 : i32
    scf.if %2 {
      %cst_10 = arith.constant 0.000000e+00 : f32
      %12 = vector.broadcast %cst_10 : f32 to vector<8x128xf32>
      %c0_11 = arith.constant 0 : index
      %c0_12 = arith.constant 0 : index
      %13 = vector.load %arg5[%c0_11, %c0_12] : memref<8x128xf32, #tpu.memory_space<vmem>>, vector<8x128xf32>
      tpu.vector_store %arg5[%c0_11, %c0_12], %12 {strides = array<i32>} : memref<8x128xf32, #tpu.memory_space<vmem>>, vector<8x128xf32>,
    } else {
    }
    %c0 = arith.constant 0 : index
    %c0_1 = arith.constant 0 : index
    %3 = vector.load %arg5[%c0, %c0_1] : memref<8x128xf32, #tpu.memory_space<vmem>>, vector<8x128xf32>
    %c0_2 = arith.constant 0 : index
    %c0_3 = arith.constant 0 : index
    %4 = vector.load %arg1[%c0_2, %c0_3] : memref<8x768xbf16, #tpu.memory_space<vmem>>, vector<8x768xbf16>
    %c0_4 = arith.constant 0 : index
    %c0_5 = arith.constant 0 : index
    %5 = vector.load %arg2[%c0_4, %c0_5] : memref<768x128xbf16, #tpu.memory_space<vmem>>, vector<768x128xbf16>
    %cst = arith.constant dense<0.000000e+00> : vector<8x128xf32>
    %6 = tpu.matmul %4, %5, %cst {dimension_numbers = #tpu.dot_dimension_numbers<[1], [0], [0], [1], [0, 0, 1, 1], [], []>} : vector<8x768xbf16>, vector<768x128xbf16>, vector<8x128xf32> -> vector<8x128xf32>
    %7 = arith.addf %3, %6 : vector<8x128xf32>
    %c0_6 = arith.constant 0 : index
    %c0_7 = arith.constant 0 : index
    %8 = vector.load %arg5[%c0_6, %c0_7] : memref<8x128xf32, #tpu.memory_space<vmem>>, vector<8x128xf32>
    tpu.vector_store %arg5[%c0_6, %c0_7], %7 {strides = array<i32>} : memref<8x128xf32, #tpu.memory_space<vmem>>, vector<8x128xf32>,
    %c0_i32_8 = arith.constant 0 : i32
    %9 = arith.cmpi eq, %arg0, %c0_i32_8 : i32
    %10 = arith.extui %9 : i1 to i32
    %c0_i32_9 = arith.constant 0 : i32
    %11 = arith.cmpi ne, %10, %c0_i32_9 : i32
    scf.if %11 {
      %c0_10 = arith.constant 0 : index
      %c0_11 = arith.constant 0 : index
      %12 = vector.load %arg5[%c0_10, %c0_11] : memref<8x128xf32, #tpu.memory_space<vmem>>, vector<8x128xf32>
      %c0_12 = arith.constant 0 : index
      %c0_13 = arith.constant 0 : index
      %13 = vector.load %arg3[%c0_12, %c0_13] : memref<1x128xf32, #tpu.memory_space<vmem>>, vector<1x128xf32>
      %14 = vector.broadcast %13 : vector<1x128xf32> to vector<8x128xf32>
      %15 = arith.addf %12, %14 : vector<8x128xf32>
      %16 = arith.mulf %15, %15 : vector<8x128xf32>
      %cst_14 = arith.constant dense<0.000000e+00> : vector<8xf32>
      %17 = vector.multi_reduction <add>, %16, %cst_14 [1] : vector<8x128xf32> to vector<8xf32>
      %18 = vector.shape_cast %17 : vector<8xf32> to vector<8x1xf32>
      %19 = math.rsqrt %18 : vector<8x1xf32>
      %cst_15 = arith.constant 1.000000e+00 : f32
      %cst_16 = arith.constant 9.99999993E-9 : f32
      %20 = arith.divf %cst_15, %cst_16 : f32
      %21 = vector.broadcast %20 : f32 to vector<8x1xf32>
      %22 = arith.minimumf %19, %21 : vector<8x1xf32>
      %23 = vector.extract_strided_slice %15 {offsets = [0, 0], sizes = [1, 128], strides = [1, 1]} : vector<8x128xf32> to vector<1x128xf32>
      %24 = vector.broadcast %23 : vector<1x128xf32> to vector<8x128xf32>
      %25 = arith.mulf %15, %24 : vector<8x128xf32>
      %cst_17 = arith.constant dense<0.000000e+00> : vector<8xf32>
      %26 = vector.multi_reduction <add>, %25, %cst_17 [1] : vector<8x128xf32> to vector<8xf32>
      %27 = vector.shape_cast %26 : vector<8xf32> to vector<8x1xf32>
      %28 = arith.mulf %27, %22 : vector<8x1xf32>
      %29 = vector.extract_strided_slice %22 {offsets = [0, 0], sizes = [1, 1], strides = [1, 1]} : vector<8x1xf32> to vector<1x1xf32>
      %30 = vector.broadcast %29 : vector<1x1xf32> to vector<8x1xf32>
      %31 = arith.mulf %28, %30 : vector<8x1xf32>
      %cst_18 = arith.constant 1.000000e+00 : f32
      %32 = vector.broadcast %cst_18 : f32 to vector<8x1xf32>
      %33 = arith.subf %32, %31 : vector<8x1xf32>
      %cst_19 = arith.constant 4.000000e+00 : f32
      %34 = vector.broadcast %cst_19 : f32 to vector<8x1xf32>
      %35 = arith.mulf %34, %33 : vector<8x1xf32>
      %36 = vector.shape_cast %35 : vector<8x1xf32> to vector<8x1xf32>
      %37 = vector.broadcast %36 : vector<8x1xf32> to vector<8x128xf32>
      %c0_20 = arith.constant 0 : index
      %c0_21 = arith.constant 0 : index
      %38 = vector.load %arg4[%c0_20, %c0_21] : memref<8x128xf32, #tpu.memory_space<vmem>>, vector<8x128xf32>
      tpu.vector_store %arg4[%c0_20, %c0_21], %37 {strides = array<i32>} : memref<8x128xf32, #tpu.memory_space<vmem>>, vector<8x128xf32>,
    } else {
    }
    return
  }
  func.func @transform_0(%arg0: i32) -> (i32, i32) {
    %c0_i32 = arith.constant 0 : i32
    %c0_i32_0 = arith.constant 0 : i32
    return %c0_i32, %arg0 : i32, i32
  }
  func.func @transform_1(%arg0: i32) -> (i32, i32) {
    %c0_i32 = arith.constant 0 : i32
    %c0_i32_0 = arith.constant 0 : i32
    return %arg0, %c0_i32 : i32, i32
  }
  func.func @transform_2(%arg0: i32) -> (i32, i32) {
    %c0_i32 = arith.constant 0 : i32
    %c0_i32_0 = arith.constant 0 : i32
    %c0_i32_1 = arith.constant 0 : i32
    return %c0_i32, %c0_i32_0 : i32, i32
  }
  func.func @transform_3(%arg0: i32) -> (i32, i32) {
    %c0_i32 = arith.constant 0 : i32
    %c0_i32_0 = arith.constant 0 : i32
    %c0_i32_1 = arith.constant 0 : i32
    return %c0_i32, %c0_i32_0 : i32, i32
  }
}

</mosaic_0001>

<bundles_post_ra>
// kernel: tpu_custom_call.1
= control target key start
LH: loop header
LB: loop body
LE: loop exit
PB: predicated region body
PF: predicated region fallthrough
CT: control target
= control target key end

     0   :  { %8 = vsyncpa [#allocation4], 0  ;;  %s952_s0 = inlined_call_operand.hbm [shape: bf16[8,768], index: 0, kind: input, shape index: {}]   ;;  %s953_s1 = inlined_call_operand.hbm [shape: bf16[768,128], index: 1, kind: input, shape index: {}]   ;;  %s954_s2 = inlined_call_operand.vmem [shape: f32[1,128], index: 2, kind: input, shape index: {}]   ;;  %s955_s3 = inlined_call_operand.hbm [shape: f32[8,128], index: 3, kind: output, shape index: {}]  }
   0x1   :  { %9 = vsyncpa [#allocation7], 0 }
   0x2   :  { %10 = vsyncpa [#allocation5], 0  ;;  %s881_s12 = smov [#allocation3]   ;;  %s882_s14 = smov [#allocation6]  }
   0x3   :  { %s17_s13 = sshll.u32 %s881_s12, 4  ;;  %s26_s15 = sshll.u32 %s882_s14, 4  ;;  %s18_s13 = int_to_ptr.vmem [resolvable:$true] %s17_s13  ;;  %s906_s15 = int_to_ptr.vmem [resolvable:$true] %s26_s15 }
   0x4   :  { %s809_s18 = scalar_lea.hbm %s952_s0, 384 }
   0x5   :  { %p810_p0 = scmp.ne.s32.totalorder %s952_s0, %s809_s18  ;;  %p813_p1 = scmp.lt.u32.totalorder %s809_s18, %s952_s0 }
   0x7   :  { %p815_p2 = pnand %p813_p1, %p810_p0 }
   0x9   :  { %818 = shalt.err (!%p815_p2)
}
   0xa   :  { %s819_s23 = scalar_lea.vmem %s18_s13, 384  ;;  %p824_p4 = scmp.lt.s32.totalorder %s18_s13, %s18_s13 }
   0xb   :  { %p820_p3 = scmp.ne.s32.totalorder %s18_s13, %s819_s23  ;;  %p825_p5 = scmp.lt.s32.totalorder %s819_s23, %s819_s23 }
   0xd   :  { %p826_p6 = por %p825_p5, %p824_p4 }
   0xf   :  { %p827_p7 = pnand %p826_p6, %p820_p3 }
  0x11   :  { %830 = shalt.err (!%p827_p7)
}
  0x12   :  { %20 = dma.hbm_to_vmem [thread:$0]  %s952_s0, 384, %s18_s13, [#allocation4]  }
  0x13   :  { %s831_s28 = scalar_lea.hbm %s953_s1, 6144 }
  0x14   :  { %p832_p8 = scmp.ne.s32.totalorder %s953_s1, %s831_s28  ;;  %p835_p9 = scmp.lt.u32.totalorder %s831_s28, %s953_s1 }
  0x16   :  { %p837_p10 = pnand %p835_p9, %p832_p8 }
  0x18   :  { %840 = shalt.err (!%p837_p10)
}
  0x19   :  { %s841_s6 = scalar_lea.vmem %s906_s15, 6144  ;;  %p846_p12 = scmp.lt.s32.totalorder %s906_s15, %s906_s15 }
  0x1a   :  { %p842_p11 = scmp.ne.s32.totalorder %s906_s15, %s841_s6  ;;  %p847_p13 = scmp.lt.s32.totalorder %s841_s6, %s841_s6 }
  0x1c   :  { %p848_p0 = por %p847_p13, %p846_p12 }
  0x1e   :  { %p849_p1 = pnand %p848_p0, %p842_p11 }
  0x20   :  { %852 = shalt.err (!%p849_p1)
}
  0x21   :  { %s883_s0 = smov 64   ;;  %s884_s7 = smov 4  }
  0x22   :  { %32 = dma.hbm_to_vmem [thread:$0]  %s953_s1, 6144, %s906_s15, [#allocation7], %s883_s0, %s883_s0, %s884_s7  }
  0x23   :  { %875 = dma.done.wait [#allocation4], 384  }
  0x24   :  { %876 = vsyncadd [#allocation4], 4294966912 }
  0x25   :  { %877 = dma.done.wait [#allocation7], 6144  }
  0x26   :  { %878 = vsyncadd [#allocation7], 4294961152  ;;  %v753_v0 = vld [vmem:[#allocation6 + $0x40] sm:$0xff]   ;;  %v757_v4 = vld [vmem:[#allocation6 + $0x48] sm:$0xff]   ;;  %s885_s11 = smov [#allocation8]  }
  0x27   :  { %v754_v1 = vld [vmem:[#allocation6 + $0xc0] sm:$0xff]   ;;  %682 = vmatprep.subr.bf16.mxu0 %v753_v0  ;;  %v758_v5 = vld [vmem:[#allocation6 + $0xc8] sm:$0xff]   ;;  %v761_v8 = vld [vmem:[#allocation6 + $0x50] sm:$0xff]   ;;  %s617_s12 = sshll.u32 %s885_s11, 4  ;;  %s618_s12 = int_to_ptr.vmem [resolvable:$true] %s617_s12 }
  0x28   :  { %v755_v2 = vld [vmem:[#allocation6] sm:$0xff]   ;;  %704 = vmatprep.subr.bf16.mxu1 %v754_v1  ;;  %v759_v6 = vld [vmem:[#allocation6 + $0x8] sm:$0xff]   ;;  %v762_v9 = vld [vmem:[#allocation6 + $0xd0] sm:$0xff]   ;;  %p858_p3 = scmp.lt.s32.totalorder %s618_s12, %s618_s12 }
  0x29   :  { %v756_v3 = vld [vmem:[#allocation6 + $0x80] sm:$0xff]   ;;  %683 = vmatpush3.bf16.msra.mxu0 %v755_v2  ;;  %v760_v7 = vld [vmem:[#allocation6 + $0x88] sm:$0xff]   ;;  %v763_v10 = vld [vmem:[#allocation6 + $0x10] sm:$0xff]  }
  0x2a   :  { %705 = vmatpush3.bf16.msra.mxu1 %v756_v3  ;;  %684 = vmatprep.subr.bf16.mxu0 %v757_v4  ;;  %v764_v11 = vld [vmem:[#allocation6 + $0x90] sm:$0xff]   ;;  %v765_v12 = vld [vmem:[#allocation6 + $0x58] sm:$0xff]   ;;  %v769_v16 = vld [vmem:[#allocation6 + $0x60] sm:$0xff]   ;;  %v595_v4 = vlaneseq }
  0x2b   :  { %706 = vmatprep.subr.bf16.mxu1 %v758_v5  ;;  %v766_v13 = vld [vmem:[#allocation6 + $0xd8] sm:$0xff]   ;;  %v770_v17 = vld [vmem:[#allocation6 + $0xe0] sm:$0xff]   ;;  %v773_v20 = vld [vmem:[#allocation6 + $0x68] sm:$0xff]  }
  0x2c   :  { %v767_v14 = vld [vmem:[#allocation6 + $0x18] sm:$0xff]   ;;  %v771_v18 = vld [vmem:[#allocation6 + $0x20] sm:$0xff]   ;;  %v774_v21 = vld [vmem:[#allocation6 + $0xe8] sm:$0xff]  }
  0x2d   :  { %685 = vmatpush3.bf16.msra.mxu0 %v759_v6  ;;  %v768_v15 = vld [vmem:[#allocation6 + $0x98] sm:$0xff]   ;;  %v772_v19 = vld [vmem:[#allocation6 + $0xa0] sm:$0xff]   ;;  %v775_v22 = vld [vmem:[#allocation6 + $0x28] sm:$0xff]   ;;  %v596_v6 = vshrl.u32 %v595_v4, 7 }
  0x2e   :  { %707 = vmatpush3.bf16.msra.mxu1 %v760_v7  ;;  %686 = vmatprep.subr.bf16.mxu0 %v761_v8  ;;  %v776_v23 = vld [vmem:[#allocation6 + $0xa8] sm:$0xff]   ;;  %v777_v24 = vld [vmem:[#allocation6 + $0x70] sm:$0xff]   ;;  %v781_v28 = vld [vmem:[#allocation6 + $0x78] sm:$0xff]  }
  0x2f   :  { %708 = vmatprep.subr.bf16.mxu1 %v762_v9  ;;  %v778_v25 = vld [vmem:[#allocation6 + $0xf0] sm:$0xff]   ;;  %v782_v29 = vld [vmem:[#allocation6 + $0xf8] sm:$0xff]   ;;  %v48_v32 = vld [vmem:[#allocation3] sm:$0xff] }
  0x30   :  { %v779_v26 = vld [vmem:[#allocation6 + $0x30] sm:$0xff]   ;;  %v783_v30 = vld [vmem:[#allocation6 + $0x38] sm:$0xff]   ;;  %v627_v34 = vcombine.low %v48_v32, %v48_v32  ;;  %v628_v35 = vcombine.high %v48_v32, %v48_v32  ;;  %v789_v38 = vld [vmem:[#allocation6 + $0x140] sm:$0xff]  }
  0x31   :  { %687 = vmatpush3.bf16.msra.mxu0 %v763_v10  ;;  %v780_v27 = vld [vmem:[#allocation6 + $0xb0] sm:$0xff]   ;;  %v784_v31 = vld [vmem:[#allocation6 + $0xb8] sm:$0xff]   ;;  %v790_v39 = vld [vmem:[#allocation6 + $0x100] sm:$0xff]  }
  0x32   :  { %709 = vmatpush3.bf16.msra.mxu1 %v764_v11  ;;  %688 = vmatprep.subr.bf16.mxu0 %v765_v12  ;;  %v49_v33 = vld [vmem:[#allocation3 + $0x8] sm:$0xff]  ;;  %v791_v40 = vld [vmem:[#allocation6 + $0x148] sm:$0xff]   ;;  %v795_v44 = vld [vmem:[#allocation6 + $0x158] sm:$0xff]  }
  0x33   :  { %710 = vmatprep.subr.bf16.mxu1 %v766_v13  ;;  %v629_v36 = vcombine.low %v49_v33, %v49_v33  ;;  %v630_v37 = vcombine.high %v49_v33, %v49_v33  ;;  %488 = vmatprep.mubr.bf16.mxu0 %v628_v35  ;;  %v792_v41 = vld [vmem:[#allocation6 + $0x108] sm:$0xff]   ;;  %v793_v42 = vld [vmem:[#allocation6 + $0x150] sm:$0xff]   ;;  %v796_v45 = vld [vmem:[#allocation6 + $0x118] sm:$0xff]   ;;  %v597_v13 = vsub.s32 0, %v596_v6 }
  0x34   :  { %v794_v43 = vld [vmem:[#allocation6 + $0x110] sm:$0xff]   ;;  %v797_v46 = vld [vmem:[#allocation6 + $0x160] sm:$0xff]   ;;  %v50_v47 = vld [vmem:[#allocation3 + $0x10] sm:$0xff] }
  0x35   :  { %689 = vmatpush3.bf16.msra.mxu0 %v767_v14  ;;  %528 = vmatprep.mubr.bf16.mxu1 %v630_v37  ;;  %v632_v48 = vcombine.high %v50_v47, %v50_v47  ;;  %v798_v49 = vld [vmem:[#allocation6 + $0x120] sm:$0xff]   ;;  %v799_v50 = vld [vmem:[#allocation6 + $0x168] sm:$0xff]   ;;  %v801_v52 = vld [vmem:[#allocation6 + $0x170] sm:$0xff]   ;;  %v631_v56 = vcombine.low %v50_v47, %v50_v47 }
  0x36   :  { %711 = vmatpush3.bf16.msra.mxu1 %v768_v15  ;;  %690 = vmatprep.subr.bf16.mxu0 %v769_v16  ;;  %v800_v51 = vld [vmem:[#allocation6 + $0x128] sm:$0xff]   ;;  %v802_v53 = vld [vmem:[#allocation6 + $0x130] sm:$0xff]   ;;  %v803_v54 = vld [vmem:[#allocation6 + $0x178] sm:$0xff]  }
  0x37   :  { %712 = vmatprep.subr.bf16.mxu1 %v770_v17  ;;  %v804_v55 = vld [vmem:[#allocation6 + $0x138] sm:$0xff]   ;;  %v681_v11 = vld [vmem:[%s954_s2] ss:$0 sm:$0xff]  ;;  %s853_s2 = scalar_lea.vmem %s618_s12, 128 }
  0x38   :  { %p854_p2 = scmp.ne.s32.totalorder %s618_s12, %s853_s2  ;;  %p859_p4 = scmp.lt.s32.totalorder %s853_s2, %s853_s2 }
  0x39   :  { %691 = vmatpush3.bf16.msra.mxu0 %v771_v18 }
  0x3a   :  { %713 = vmatpush3.bf16.msra.mxu1 %v772_v19  ;;  %692 = vmatprep.subr.bf16.mxu0 %v773_v20  ;;  %p860_p5 = por %p859_p4, %p858_p3 }
  0x3b   :  { %714 = vmatprep.subr.bf16.mxu1 %v774_v21 }
  0x3c   :  { %p861_p6 = pnand %p860_p5, %p854_p2 }
  0x3d   :  { %693 = vmatpush3.bf16.msra.mxu0 %v775_v22 }
  0x3e   :  { %715 = vmatpush3.bf16.msra.mxu1 %v776_v23  ;;  %694 = vmatprep.subr.bf16.mxu0 %v777_v24 }
  0x3f   :  { %716 = vmatprep.subr.bf16.mxu1 %v778_v25 }
  0x41   :  { %695 = vmatpush3.bf16.msra.mxu0 %v779_v26 }
  0x42   :  { %717 = vmatpush3.bf16.msra.mxu1 %v780_v27  ;;  %696 = vmatprep.subr.bf16.mxu0 %v781_v28 }
  0x43   :  { %718 = vmatprep.subr.bf16.mxu1 %v782_v29 }
  0x45   :  { %697 = vmatpush3.bf16.msra.mxu0 %v783_v30 }
  0x46   :  { %719 = vmatpush3.bf16.msra.mxu1 %v784_v31  ;;  %726 = vmatprep.subr.bf16.mxu0 %v789_v38 }
  0x48   :  { %489 = vmatmul.mubr.bf16.vlgmr.msra.gmra.mrb[0].mxu0 %v627_v34 }
  0x49   :  { %529 = vmatmul.mubr.bf16.vlgmr.msra.gmra.mrb[0].mxu1 %v629_v36  ;;  %727 = vmatpush3.bf16.msra.mxu0 %v790_v39 }
  0x4a   :  { %728 = vmatprep.subr.bf16.mxu0 %v791_v40  ;;  %568 = vmatprep.mubr.bf16.mxu0 %v632_v48 }
  0x4d   :  { %729 = vmatpush3.bf16.msra.mxu0 %v792_v41 }
  0x4e   :  { %730 = vmatprep.subr.bf16.mxu0 %v793_v42 }
  0x51   :  { %731 = vmatpush3.bf16.msra.mxu0 %v794_v43 }
  0x52   :  { %732 = vmatprep.subr.bf16.mxu0 %v795_v44 }
  0x55   :  { %733 = vmatpush3.bf16.msra.mxu0 %v796_v45 }
  0x56   :  { %734 = vmatprep.subr.bf16.mxu0 %v797_v46 }
  0x59   :  { %735 = vmatpush3.bf16.msra.mxu0 %v798_v49 }
  0x5a   :  { %736 = vmatprep.subr.bf16.mxu0 %v799_v50 }
  0x5d   :  { %737 = vmatpush3.bf16.msra.mxu0 %v800_v51 }
  0x5e   :  { %738 = vmatprep.subr.bf16.mxu0 %v801_v52 }
  0x61   :  { %739 = vmatpush3.bf16.msra.mxu0 %v802_v53 }
  0x62   :  { %740 = vmatprep.subr.bf16.mxu0 %v803_v54 }
  0x65   :  { %741 = vmatpush3.bf16.msra.mxu0 %v804_v55 }
  0x68   :  { %569 = vmatmul.mubr.bf16.vlgmr.msra.gmra.mrb[4].mxu0 %v631_v56 }
 0x11b   :  { %v698_v57 = vpop.f32.mrb[0].mxu0 }
 0x11c   :  { %v720_v58 = vpop.f32.mrb[0].mxu1  ;;  %v699_v59 = vpop.f32.mrb[1].mxu0 }
 0x11d   :  { %v721_v60 = vpop.f32.mrb[1].mxu1  ;;  %v700_v61 = vadd.f32 %v699_v59, %v698_v57  ;;  %v701_v63 = vpop.f32.mrb[2].mxu0 }
 0x11e   :  { %v722_v62 = vadd.f32 %v721_v60, %v720_v58  ;;  %v723_v0 = vpop.f32.mrb[2].mxu1  ;;  %v702_v1 = vpop.f32.mrb[3].mxu0 }
 0x11f   :  { %v724_v2 = vpop.f32.mrb[3].mxu1 }
 0x120   :  { %v531_v3 = vadd.f32 %v722_v62, %v700_v61 }
 0x13b   :  { %v742_v5 = vpop.f32.mrb[4].mxu0 }
 0x13c   :  { %v743_v7 = vpop.f32.mrb[5].mxu0 }
 0x13d   :  { %v744_v8 = vadd.f32 %v743_v7, %v742_v5  ;;  %v745_v9 = vpop.f32.mrb[6].mxu0 }
 0x13e   :  { %v746_v10 = vpop.f32.mrb[7].mxu0 }
 0x13f   :  { %v571_v12 = vadd.f32 %v744_v8, %v531_v3 }
 0x141   :  { %v589_v14 = vadd.f32 %v681_v11, %v571_v12 }
 0x143   :  { %v590_v15 = vmul.f32 %v589_v14, %v589_v14  ;;  %v598_v16 = vrot.slane %v589_v14, %v597_v13 }
 0x145   :  { %591 = vadd.xlane.f32.xlu0 %v590_v15  ;;  %v599_v17 = vmul.f32 %v598_v16, %v589_v14 }
 0x149   :  { %600 = vadd.xlane.f32.xlu0 %v599_v17 }
 0x1d2   :  { %v592_v18 = vpop.xlane.xlu0 %591 }
 0x1d3   :  { %807 = vrsqrt.f32 %v592_v18 }
 0x1d6   :  { %v601_v21 = vpop.xlane.xlu0 %600 }
 0x1dd   :  { %v808_v19 = vpop.eup %807 }
 0x1de   :  { %v594_v20 = vmin.f32 %v808_v19, 1e+08 }
 0x1e0   :  { %v606_v22 = vrot.slane %v594_v20, %v597_v13  ;;  %v602_v23 = vmul.f32 %v601_v21, %v594_v20 }
 0x1e2   :  { %v607_v24 = vmul.f32 %v606_v22, %v602_v23 }
 0x1e4   :  { %v608_v25 = vsub.f32 1.0, %v607_v24 }
 0x1e6   :  { %v609_v26 = vmul.f32 4.0, %v608_v25 }
 0x1e8   :  { %610 = vst [vmem:[#allocation8] sm:$0xff] %v609_v26 }
 0x1e9   :  { %864 = shalt.err (!%p861_p6)
}
 0x1ea   :  { %s865_s15 = scalar_lea.hbm %s955_s3, 128 }
 0x1eb   :  { %p866_p7 = scmp.ne.s32.totalorder %s955_s3, %s865_s15  ;;  %p869_p8 = scmp.lt.u32.totalorder %s865_s15, %s955_s3 }
 0x1ed   :  { %p871_p9 = pnand %p869_p8, %p866_p7 }
 0x1ef   :  { %874 = shalt.err (!%p871_p9)
}
 0x1f0   :  { %620 = dma.vmem_to_hbm [thread:$0]  %s618_s12, 128, %s955_s3, [#allocation5]  }
 0x1f1   :  { %879 = dma.done.wait [#allocation5], 128  }
 0x1f2   :  { %880 = vsyncadd [#allocation5], 4294967168 }
 0x1f3   :  { %624 = vsyncpa [#allocation4], 1 }
 0x1f4   :  { %625 = vsyncpa [#allocation7], 1 }
 0x1f5   :  { %626 = vsyncpa [#allocation5], 1 }

</bundles_post_ra>
